<compile_context>
chip_gen: v7x
topology: tpu7x:2x2x1
jax: 0.10.0
libtpu: 0.0.40
codegen_flags: <defaults>
</compile_context>

<pallas_src>
import jax
import jax.numpy as jnp
from jax.experimental import pallas as pl
from jax.experimental.pallas import tpu as pltpu


def _mlp_kernel(xa_ref, xr_ref, w1a_ref, w1b_ref, b1_ref, w2_ref, b2_ref,
                o_ref):
    """out = relu([xa, xr] @ W1 + b1) @ W2 + b2, f32 accumulate / f32 epilogue."""
    mxu_dtype = w1a_ref.dtype
    # Cast activations to the (possibly bf16) weight dtype for the MXU push.
    xa = xa_ref[...].astype(mxu_dtype)
    xr = xr_ref[...].astype(mxu_dtype)
    # fc1 as two accumulated dots (replaces the host-side concat).
    h = jnp.dot(xa, w1a_ref[...], preferred_element_type=jnp.float32)
    h = h + jnp.dot(xr, w1b_ref[...], preferred_element_type=jnp.float32)
    # Bias add + ReLU in f32 on the VPU.
    h = jnp.maximum(h + b1_ref[...], 0.0)
    # fc2 + bias, f32 accumulate.
    out = jnp.dot(h.astype(w2_ref.dtype), w2_ref[...],
                  preferred_element_type=jnp.float32) + b2_ref[...]
    o_ref[...] = out.astype(o_ref.dtype)


def prepare_params(params, *, mxu_dtype=jnp.bfloat16):
    """One-time parameter prep: split W1 for the two input streams and cast
    matmul operands to `mxu_dtype`.  Biases stay f32 (f32 epilogue).

    params = (w1, b1, w2, b2) with
      w1: (2*input_size, hidden)   b1: (1, hidden)
      w2: (hidden, num_classes)    b2: (1, num_classes)
    """
    w1, b1, w2, b2 = params
    input_size = w1.shape[0] // 2
    w1a = w1[:input_size].astype(mxu_dtype)
    w1b = w1[input_size:].astype(mxu_dtype)
    return (w1a, w1b, b1.astype(jnp.float32), w2.astype(mxu_dtype),
            b2.astype(jnp.float32))


def simple_mlp_forward(mean_audio, mean_rgb, prepared_params):
    """Pallas TPU implementation of SimpleMLP.forward.

    `prepared_params` must come from prepare_params(); the forward path adds
    no wrapper-side XLA ops beyond the pallas_call itself.
    """
    w1a, w1b, b1, w2, b2 = prepared_params
    batch = mean_audio.shape[0]
    num_classes = w2.shape[1]

    vmem = pl.BlockSpec(memory_space=pltpu.MemorySpace.VMEM)

    return pl.pallas_call(
        _mlp_kernel,
        out_shape=jax.ShapeDtypeStruct((batch, num_classes), jnp.float32),
        in_specs=[vmem] * 7,
        out_specs=vmem,
    )(mean_audio, mean_rgb, w1a, w1b, b1, w2, b2)


def init_params(key, input_size, hidden_size, num_classes):
    """Deterministic synthetic init matching nn.Linear shapes (stored (in, out))."""
    k1, k2, k3, k4 = jax.random.split(key, 4)
    scale1 = 1.0 / jnp.sqrt(jnp.float32(2 * input_size))
    w1 = jax.random.uniform(k1, (2 * input_size, hidden_size), jnp.float32,
                            -scale1, scale1)
    b1 = jax.random.uniform(k2, (1, hidden_size), jnp.float32, -scale1, scale1)
    scale2 = 1.0 / jnp.sqrt(jnp.float32(hidden_size))
    w2 = jax.random.uniform(k3, (hidden_size, num_classes), jnp.float32,
                            -scale2, scale2)
    b2 = jax.random.uniform(k4, (1, num_classes), jnp.float32, -scale2, scale2)
    return (w1, b1, w2, b2)


if __name__ == "__main__":
    batch = 8
    input_size = 64       # each of mean_audio / mean_rgb has this many features
    hidden_size = 32
    num_classes = 16

    key = jax.random.PRNGKey(0)
    k_a, k_r, k_p = jax.random.split(key, 3)
    mean_audio = jax.random.normal(k_a, (batch, input_size), jnp.float32)
    mean_rgb = jax.random.normal(k_r, (batch, input_size), jnp.float32)
    params = init_params(k_p, input_size, hidden_size, num_classes)

    # Pure-JAX f32 reference (same math as the PyTorch module).
    w1, b1, w2, b2 = params
    combined = jnp.concatenate([mean_audio, mean_rgb], axis=1)
    ref = jnp.maximum(combined @ w1 + b1, 0.0) @ w2 + b2

    # 1) f32 MXU path: exact semantics check, tight tolerance.
    prepared_f32 = prepare_params(params, mxu_dtype=jnp.float32)
    out_f32 = jax.block_until_ready(
        simple_mlp_forward(mean_audio, mean_rgb, prepared_f32))
    assert out_f32.shape == (batch, num_classes)
    assert jnp.allclose(out_f32, ref, atol=1e-5, rtol=1e-5)

    # 2) bf16-weight path (the performance default): looser tolerance vs the
    #    f32 reference to account for bf16 operand rounding (f32 accumulate).
    prepared_bf16 = prepare_params(params, mxu_dtype=jnp.bfloat16)
    out_bf16 = jax.block_until_ready(
        simple_mlp_forward(mean_audio, mean_rgb, prepared_bf16))
    assert out_bf16.shape == (batch, num_classes)
    assert jnp.allclose(out_bf16, ref, atol=5e-2, rtol=5e-2)

    print("KERNEL_OK")
</pallas_src>

<mosaic_0001>
module attributes {stable_mosaic.version = 11 : i64} {
  func.func @_mlp_kernel(%arg0: memref<8x64xf32, #tpu.memory_space<vmem>>, %arg1: memref<8x64xf32, #tpu.memory_space<vmem>>, %arg2: memref<64x32xf32, #tpu.memory_space<vmem>>, %arg3: memref<64x32xf32, #tpu.memory_space<vmem>>, %arg4: memref<1x32xf32, #tpu.memory_space<vmem>>, %arg5: memref<32x16xf32, #tpu.memory_space<vmem>>, %arg6: memref<1x16xf32, #tpu.memory_space<vmem>>, %arg7: memref<8x16xf32, #tpu.memory_space<vmem>>) attributes {dimension_semantics = [], scalar_prefetch = 0 : i64, scratch_operands = 0 : i64, tpu.core_type = #tpu.core_type<tc>} {
    %c0 = arith.constant 0 : index
    %c0_0 = arith.constant 0 : index
    %0 = vector.load %arg0[%c0, %c0_0] : memref<8x64xf32, #tpu.memory_space<vmem>>, vector<8x64xf32>
    %c0_1 = arith.constant 0 : index
    %c0_2 = arith.constant 0 : index
    %1 = vector.load %arg1[%c0_1, %c0_2] : memref<8x64xf32, #tpu.memory_space<vmem>>, vector<8x64xf32>
    %c0_3 = arith.constant 0 : index
    %c0_4 = arith.constant 0 : index
    %2 = vector.load %arg2[%c0_3, %c0_4] : memref<64x32xf32, #tpu.memory_space<vmem>>, vector<64x32xf32>
    %cst = arith.constant dense<0.000000e+00> : vector<8x32xf32>
    %3 = tpu.matmul %0, %2, %cst {dimension_numbers = #tpu.dot_dimension_numbers<[1], [0], [0], [1], [0, 0, 1, 1], [], []>} : vector<8x64xf32>, vector<64x32xf32>, vector<8x32xf32> -> vector<8x32xf32>
    %c0_5 = arith.constant 0 : index
    %c0_6 = arith.constant 0 : index
    %4 = vector.load %arg3[%c0_5, %c0_6] : memref<64x32xf32, #tpu.memory_space<vmem>>, vector<64x32xf32>
    %cst_7 = arith.constant dense<0.000000e+00> : vector<8x32xf32>
    %5 = tpu.matmul %1, %4, %cst_7 {dimension_numbers = #tpu.dot_dimension_numbers<[1], [0], [0], [1], [0, 0, 1, 1], [], []>} : vector<8x64xf32>, vector<64x32xf32>, vector<8x32xf32> -> vector<8x32xf32>
    %6 = arith.addf %3, %5 : vector<8x32xf32>
    %c0_8 = arith.constant 0 : index
    %c0_9 = arith.constant 0 : index
    %7 = vector.load %arg4[%c0_8, %c0_9] : memref<1x32xf32, #tpu.memory_space<vmem>>, vector<1x32xf32>
    %8 = vector.broadcast %7 : vector<1x32xf32> to vector<8x32xf32>
    %9 = arith.addf %6, %8 : vector<8x32xf32>
    %cst_10 = arith.constant 0.000000e+00 : f32
    %10 = vector.broadcast %cst_10 : f32 to vector<8x32xf32>
    %11 = arith.maximumf %9, %10 : vector<8x32xf32>
    %c0_11 = arith.constant 0 : index
    %c0_12 = arith.constant 0 : index
    %12 = vector.load %arg5[%c0_11, %c0_12] : memref<32x16xf32, #tpu.memory_space<vmem>>, vector<32x16xf32>
    %cst_13 = arith.constant dense<0.000000e+00> : vector<8x16xf32>
    %13 = tpu.matmul %11, %12, %cst_13 {dimension_numbers = #tpu.dot_dimension_numbers<[1], [0], [0], [1], [0, 0, 1, 1], [], []>} : vector<8x32xf32>, vector<32x16xf32>, vector<8x16xf32> -> vector<8x16xf32>
    %c0_14 = arith.constant 0 : index
    %c0_15 = arith.constant 0 : index
    %14 = vector.load %arg6[%c0_14, %c0_15] : memref<1x16xf32, #tpu.memory_space<vmem>>, vector<1x16xf32>
    %15 = vector.broadcast %14 : vector<1x16xf32> to vector<8x16xf32>
    %16 = arith.addf %13, %15 : vector<8x16xf32>
    %c0_16 = arith.constant 0 : index
    %c0_17 = arith.constant 0 : index
    %17 = vector.load %arg7[%c0_16, %c0_17] : memref<8x16xf32, #tpu.memory_space<vmem>>, vector<8x16xf32>
    tpu.vector_store %arg7[%c0_16, %c0_17], %16 {strides = array<i32>} : memref<8x16xf32, #tpu.memory_space<vmem>>, vector<8x16xf32>,
    return
  }
}

</mosaic_0001>

<bundles_post_ra>
// kernel: tpu_custom_call.1
= control target key start
LH: loop header
LB: loop body
LE: loop exit
PB: predicated region body
PF: predicated region fallthrough
CT: control target
= control target key end

     0   :  { %v437_v3 = vmov 0.0|0.0   ;;  %vm438_vm0 = vmmov 0   ;;  %v439_v11 = vmov 0.0   ;;  %s568_s0 = inlined_call_operand.vmem [shape: f32[8,64], index: 0, kind: input, shape index: {}]   ;;  %s569_s1 = inlined_call_operand.vmem [shape: f32[8,64], index: 1, kind: input, shape index: {}]   ;;  %s570_s2 = inlined_call_operand.vmem [shape: f32[64,32], index: 2, kind: input, shape index: {}]   ;;  %s571_s3 = inlined_call_operand.vmem [shape: f32[64,32], index: 3, kind: input, shape index: {}]   ;;  %s572_s4 = inlined_call_operand.vmem [shape: f32[1,32], index: 4, kind: input, shape index: {}]   ;;  %s573_s5 = inlined_call_operand.vmem [shape: f32[32,16], index: 5, kind: input, shape index: {}]   ;;  %s574_s6 = inlined_call_operand.vmem [shape: f32[1,16], index: 6, kind: input, shape index: {}]   ;;  %s575_s7 = inlined_call_operand.hbm [shape: f32[8,16], index: 7, kind: output, shape index: {}]  }
   0x1   :  { %v37_v0 = vld [vmem:[%s571_s3] sm:$0xff]  ;;  %v38_v1 = vld [vmem:[%s571_s3 + $0x8] sm:$0xff]  ;;  %379 = vmatprep.subr.bf16.mxu0 %v437_v3  ;;  %391 = vmatprep.subr.bf16.mxu1 %v437_v3  ;;  %v39_v6 = vld [vmem:[%s571_s3 + $0x10] sm:$0xff] }
   0x2   :  { %v29_v2 = vld [vmem:[%s570_s2] sm:$0xff]  ;;  %v380_v4 = vpack.c.bf16 %v38_v1, %v37_v0  ;;  %v30_v5 = vld [vmem:[%s570_s2 + $0x8] sm:$0xff]  ;;  %v40_v7 = vld [vmem:[%s571_s3 + $0x18] sm:$0xff]  ;;  %346 = vmatprep.mubr.msk.f32.mxu0 %vm438_vm0, %v439_v11  ;;  %365 = vmatprep.mubr.msk.f32.mxu1 %vm438_vm0, %v439_v11 }
   0x3   :  { %v392_v8 = vpack.c.bf16 %v30_v5, %v29_v2  ;;  %v31_v9 = vld [vmem:[%s570_s2 + $0x10] sm:$0xff]  ;;  %v32_v10 = vld [vmem:[%s570_s2 + $0x18] sm:$0xff]  ;;  %v383_v12 = vpack.c.bf16 %v40_v7, %v39_v6  ;;  %v41_v14 = vld [vmem:[%s571_s3 + $0x20] sm:$0xff] }
   0x4   :  { %381 = vmatpush3.bf16.msra.mxu0 %v380_v4  ;;  %v395_v13 = vpack.c.bf16 %v32_v10, %v31_v9  ;;  %v42_v15 = vld [vmem:[%s571_s3 + $0x28] sm:$0xff]  ;;  %v33_v16 = vld [vmem:[%s570_s2 + $0x20] sm:$0xff] }
   0x5   :  { %393 = vmatpush3.bf16.msra.mxu1 %v392_v8  ;;  %382 = vmatprep.subr.bf16.mxu0 %v437_v3  ;;  %v34_v17 = vld [vmem:[%s570_s2 + $0x28] sm:$0xff] }
   0x6   :  { %394 = vmatprep.subr.bf16.mxu1 %v437_v3 }
   0x7   :  { %12 = vsyncpa [#allocation3], 0  ;;  %v386_v18 = vpack.c.bf16 %v42_v15, %v41_v14  ;;  %v398_v19 = vpack.c.bf16 %v34_v17, %v33_v16  ;;  %v43_v20 = vld [vmem:[%s571_s3 + $0x30] sm:$0xff]  ;;  %v44_v21 = vld [vmem:[%s571_s3 + $0x38] sm:$0xff]  ;;  %vm45_vm1 = vcmask 523264   ;;  %vm212_vm2 = vcmask 261120  }
   0x8   :  { %384 = vmatpush3.bf16.msra.mxu0 %v383_v12  ;;  %v35_v22 = vld [vmem:[%s570_s2 + $0x30] sm:$0xff]  ;;  %v36_v23 = vld [vmem:[%s570_s2 + $0x38] sm:$0xff]  ;;  %v389_v24 = vpack.c.bf16 %v44_v21, %v43_v20  ;;  %v28_v26 = vld [vmem:[%s569_s1] sm:$0xff]  ;;  %vm286_vm3 = vcmask 130048  }
   0x9   :  { %396 = vmatpush3.bf16.msra.mxu1 %v395_v13  ;;  %385 = vmatprep.subr.bf16.mxu0 %v437_v3  ;;  %v401_v25 = vpack.c.bf16 %v36_v23, %v35_v22  ;;  %v27_v27 = vld [vmem:[%s568_s0] sm:$0xff]  ;;  %v202_v29 = vld [vmem:[%s573_s5 + $0x8] sm:$0xff]  ;;  %v203_v31 = vld [vmem:[%s573_s5 + $0x10] sm:$0xff] }
   0xa   :  { %397 = vmatprep.subr.bf16.mxu1 %v437_v3  ;;  %v201_v28 = vld [vmem:[%s573_s5] sm:$0xff]  ;;  %v204_v32 = vld [vmem:[%s573_s5 + $0x18] sm:$0xff]  ;;  %s440_s5 = smov [#allocation2]  }
   0xb   :  { %v404_v30 = vpack.c.bf16 %v202_v29, %v201_v28  ;;  %v407_v33 = vpack.c.bf16 %v204_v32, %v203_v31  ;;  %v304_v36 = vld [vmem:[%s572_s4] ss:$0 sm:$0xff]  ;;  %s294_s22 = sshll.u32 %s440_s5, 4  ;;  %s295_s22 = int_to_ptr.vmem [resolvable:$true] %s294_s22 }
   0xc   :  { %387 = vmatpush3.bf16.msra.mxu0 %v386_v18  ;;  %v305_v42 = vld [vmem:[%s574_s6] ss:$0 sm:$0xff]  ;;  %s413_s4 = scalar_lea.vmem %s295_s22, 128  ;;  %p418_p1 = scmp.lt.s32.totalorder %s295_s22, %s295_s22 }
   0xd   :  { %399 = vmatpush3.bf16.msra.mxu1 %v398_v19  ;;  %388 = vmatprep.subr.bf16.mxu0 %v437_v3  ;;  %p414_p0 = scmp.ne.s32.totalorder %s295_s22, %s413_s4  ;;  %p419_p2 = scmp.lt.s32.totalorder %s413_s4, %s413_s4 }
   0xe   :  { %400 = vmatprep.subr.bf16.mxu1 %v437_v3 }
   0xf   :  { %p420_p3 = por %p419_p2, %p418_p1 }
  0x10   :  { %390 = vmatpush3.bf16.msra.mxu0 %v389_v24 }
  0x11   :  { %402 = vmatpush3.bf16.msra.mxu1 %v401_v25  ;;  %403 = vmatprep.subr.bf16.mxu0 %v437_v3  ;;  %p421_p4 = pnand %p420_p3, %p414_p0 }
  0x13   :  { %347 = vmatmul.mubr.msk.f32.vlgmr.msra.gmra.mrb[0].mxu0 %vm45_vm1, %v28_v26 }
  0x14   :  { %366 = vmatmul.mubr.msk.f32.vlgmr.msra.gmra.mrb[0].mxu1 %vm45_vm1, %v27_v27  ;;  %376 = vmatprep.mubr.msk.f32.mxu0 %vm438_vm0, %v439_v11 }
  0x15   :  { %405 = vmatpush3.bf16.msra.mxu0 %v404_v30 }
  0x16   :  { %406 = vmatprep.subr.bf16.mxu0 %v437_v3 }
  0x19   :  { %408 = vmatpush3.bf16.msra.mxu0 %v407_v33 }
  0xe6   :  { %v115_v34 = vpop.f32.mrb[0].mxu0 }
  0xe7   :  { %v188_v35 = vpop.f32.mrb[0].mxu1  ;;  %v348_v37 = vpop.f32.mrb[1].mxu0 }
  0xe8   :  { %v189_v38 = vadd.f32 %v188_v35, %v115_v34  ;;  %v367_v39 = vpop.f32.mrb[1].mxu1 }
  0xea   :  { %v199_v40 = vadd.f32 %v304_v36, %v189_v38 }
  0xec   :  { %v200_v41 = vmax.f32 %v199_v40, 0.0 }
  0xee   :  { %377 = vmatmul.mubr.msk.f32.vlgmr.msra.gmra.mrb[2].mxu0 %vm212_vm2, %v200_v41 }
 0x1c1   :  { %v282_v43 = vpop.f32.mrb[2].mxu0 }
 0x1c2   :  { %v283_v44 = vadd.f32 %v305_v42, %v282_v43  ;;  %v378_v45 = vpop.f32.mrb[3].mxu0 }
 0x1c4   :  { %287 = vst.msk [vmem:[#allocation2] sm:$0xff] %vm286_vm3, %v283_v44 }
 0x1c5   :  { %424 = shalt.err (!%p421_p4)
}
 0x1c6   :  { %s425_s25 = scalar_lea.hbm %s575_s7, 128 }
 0x1c7   :  { %p426_p5 = scmp.ne.s32.totalorder %s575_s7, %s425_s25  ;;  %p429_p6 = scmp.lt.u32.totalorder %s425_s25, %s575_s7 }
 0x1c9   :  { %p431_p7 = pnand %p429_p6, %p426_p5 }
 0x1cb   :  { %434 = shalt.err (!%p431_p7)
}
 0x1cc   :  { %297 = dma.vmem_to_hbm [thread:$0]  %s295_s22, 128, %s575_s7, [#allocation3]  }
 0x1cd   :  { %435 = dma.done.wait [#allocation3], 128  }
 0x1ce   :  { %436 = vsyncadd [#allocation3], 4294967168 }
 0x1cf   :  { %301 = vsyncpa [#allocation3], 1 }

</bundles_post_ra>
